<compile_context>
chip_gen: v6e
topology: v6e:2x2x1
jax: 0.10.0
libtpu: 0.0.40
codegen_flags: <defaults>
</compile_context>

<pallas_src>
import functools

import jax
import jax.numpy as jnp
from jax import lax
from jax.experimental import pallas as pl
from jax.experimental.pallas import tpu as pltpu

_LANES = 128                       # vreg lane width; running stats kept lane-replicated
_VMEM_LIMIT = 48 * 1024 * 1024     # explicit scoped-VMEM budget (safe on v5e/v6e/v7x)


def _flash_attn_kernel(q_ref, k_ref, v_ref, o_ref, qs_ref, m_ref, l_ref, acc_ref,
                       *, scale, exact_norm):
    """One (batch*head, q-tile, kv-tile) grid step of online-softmax attention.

    q_ref: (TQ, D)   k_ref / v_ref: (TK, D)   o_ref: (TQ, D)
    qs_ref: (TQ, D) input-dtype scratch holding q*scale (written once per q tile)
    m_ref / l_ref: (TQ, 128) lane-replicated f32 running max / sum
    acc_ref: (TQ, D) f32 running output.
    """
    kv = pl.program_id(2)
    head_dim = q_ref.shape[-1]

    @pl.when(kv == 0)
    def _():
        # Softmax scale folded into q once per q tile (hoisted out of the kv loop);
        # stays in the input dtype so the MXU runs bf16 when inputs are bf16.
        qs_ref[...] = (q_ref[...] * scale).astype(qs_ref.dtype)
        m_ref[...] = jnp.full_like(m_ref, -jnp.inf)
        l_ref[...] = jnp.zeros_like(l_ref)
        acc_ref[...] = jnp.zeros_like(acc_ref)

    q = qs_ref[...]
    k = k_ref[...]
    v = v_ref[...]

    # scores (TQ, TK): contract the D axis of both operands directly (no k.T transpose).
    s = lax.dot_general(
        q,
        k,
        dimension_numbers=(((1,), (1,)), ((), ())),
        preferred_element_type=jnp.float32,
    )

    # Online (streaming) softmax update in f32.  Stats are lane-replicated (TQ, 128) so
    # scratch loads/stores are full unmasked vregs (no vst.msk / per-step lane broadcast).
    m_prev = m_ref[...]                                     # (TQ, 128)
    s_max = jnp.max(s, axis=-1, keepdims=True)              # (TQ, 1)
    m_new = jnp.maximum(m_prev, s_max)                      # (TQ, 128)
    m_new_col = jnp.maximum(m_prev[:, :1], s_max)           # (TQ, 1), same value per row
    alpha = jnp.exp(m_prev - m_new)                         # (TQ, 128)
    p = jnp.exp(s - m_new_col)                              # (TQ, TK) f32

    l_ref[...] = alpha * l_ref[...] + jnp.sum(p, axis=-1, keepdims=True)
    alpha_d = alpha if head_dim == _LANES else alpha[:, :1]
    acc_ref[...] = alpha_d * acc_ref[...] + jnp.dot(
        p.astype(v.dtype), v, preferred_element_type=jnp.float32
    )
    m_ref[...] = m_new

    @pl.when(kv == pl.num_programs(2) - 1)
    def _():
        l = l_ref[...]
        if exact_norm:
            inv_l = 1.0 / l                          # exact normalization for f32 parity
        else:
            inv_l = pl.reciprocal(l, approx=True)    # EUP vrcp; fine for bf16 outputs
        inv_d = inv_l if head_dim == _LANES else inv_l[:, :1]
        o_ref[...] = (acc_ref[...] * inv_d).astype(o_ref.dtype)


def _pick_kv_tile(n):
    for t in (1024, 512, 256, 128):
        if n % t == 0:
            return t
    return n  # small / odd sequence: full extent (block == array dim is legal)


def _pick_q_tile(n, bh):
    cands = [t for t in (512, 256, 128) if n % t == 0]
    if not cands:
        return n
    for t in cands:                 # largest tq that keeps >= 8 parallel grid steps
        if bh * (n // t) >= 8:
            return t
    return cands[-1]                # tiny-batch shapes: prefer parallel balance, grow tk


def flash_attention(q, k, v, *, tq=None, tk=None, kv_buffers=None, bf16_matmul=False):
    """softmax(q @ k^T / sqrt(D)) @ v for q: (B, H, N, D), k/v: (B, H, Nk, D)."""
    B, H, N, D = q.shape
    Nk = k.shape[-2]
    assert k.shape == (B, H, Nk, D) and v.shape == (B, H, Nk, D)
    out_dtype = q.dtype
    scale = float(D) ** (-0.5)

    # Optional ~4x MXU-throughput path for f32 callers (documented numerics tradeoff).
    if bf16_matmul and q.dtype == jnp.float32:
        q, k, v = (x.astype(jnp.bfloat16) for x in (q, k, v))

    if tq is None:
        tq = _pick_q_tile(N, B * H)
    if tk is None:
        tk = _pick_kv_tile(Nk)
    assert N % tq == 0 and Nk % tk == 0

    qf = q.reshape(B * H, N, D)
    kf = k.reshape(B * H, Nk, D)
    vf = v.reshape(B * H, Nk, D)

    grid = (B * H, N // tq, Nk // tk)
    exact_norm = bool(jnp.dtype(out_dtype) == jnp.dtype(jnp.float32))
    kernel = functools.partial(_flash_attn_kernel, scale=scale, exact_norm=exact_norm)

    # Optional deeper k/v pipelining (useful on v7x where per-step DMA ~ per-step compute).
    kv_kwargs = {} if kv_buffers is None else dict(pipeline_mode=pl.Buffered(kv_buffers))

    # Accurate scheduler hint: 2 matmuls (QK^T, PV), one exp per score, q/o streamed once,
    # k/v re-streamed once per q tile.
    restream = N // tq
    cost = pl.CostEstimate(
        flops=4 * B * H * N * Nk * D,
        transcendentals=B * H * N * Nk,
        bytes_accessed=int(
            qf.size * qf.dtype.itemsize
            + B * H * N * D * jnp.dtype(out_dtype).itemsize
            + (kf.size * kf.dtype.itemsize + vf.size * vf.dtype.itemsize) * restream
        ),
    )

    out = pl.pallas_call(
        kernel,
        out_shape=jax.ShapeDtypeStruct((B * H, N, D), out_dtype),
        grid_spec=pltpu.PrefetchScalarGridSpec(
            num_scalar_prefetch=0,
            grid=grid,
            in_specs=[
                pl.BlockSpec((pl.Squeezed(), tq, D), lambda b, i, j: (b, i, 0)),
                pl.BlockSpec((pl.Squeezed(), tk, D), lambda b, i, j: (b, j, 0), **kv_kwargs),
                pl.BlockSpec((pl.Squeezed(), tk, D), lambda b, i, j: (b, j, 0), **kv_kwargs),
            ],
            # Output block is constant across the kv axis -> stays resident (accumulator).
            out_specs=pl.BlockSpec((pl.Squeezed(), tq, D), lambda b, i, j: (b, i, 0)),
            scratch_shapes=[
                pltpu.VMEM((tq, D), qf.dtype),           # q * scale (written at kv == 0)
                pltpu.VMEM((tq, _LANES), jnp.float32),   # running max  m (lane-replicated)
                pltpu.VMEM((tq, _LANES), jnp.float32),   # running sum  l (lane-replicated)
                pltpu.VMEM((tq, D), jnp.float32),        # running out  acc
            ],
        ),
        compiler_params=pltpu.CompilerParams(
            dimension_semantics=("parallel", "parallel", "arbitrary"),
            vmem_limit_bytes=_VMEM_LIMIT,
        ),
        cost_estimate=cost,
    )(qf, kf, vf)

    return out.reshape(B, H, N, D)


def _reference(q, k, v):
    qf, kf, vf = (x.astype(jnp.float32) for x in (q, k, v))
    scale = q.shape[-1] ** (-0.5)
    s = jnp.einsum("bhid,bhjd->bhij", qf, kf) * scale
    a = jax.nn.softmax(s, axis=-1)
    return jnp.einsum("bhij,bhjd->bhid", a, vf)


if __name__ == "__main__":
    # Case 1: small f32 shapes consistent with the module (single-tile path, exact norm).
    B, H, N, D = 2, 4, 8, 32
    kq, kk, kv = jax.random.split(jax.random.PRNGKey(0), 3)
    q = jax.random.normal(kq, (B, H, N, D), dtype=jnp.float32)
    k = jax.random.normal(kk, (B, H, N, D), dtype=jnp.float32)
    v = jax.random.normal(kv, (B, H, N, D), dtype=jnp.float32)

    out = jax.block_until_ready(flash_attention(q, k, v))
    ref = _reference(q, k, v)
    assert out.shape == (B, H, N, D)
    assert jnp.allclose(out, ref, atol=2e-3, rtol=2e-3), "f32 single-tile mismatch"

    # Case 2: bf16 multi-tile path (auto tile selection, 2 q-tiles x 3 kv-tiles) exercising
    # the online softmax accumulation across kv steps.
    B2, H2, N2, Nk2, D2 = 1, 2, 256, 384, 128
    kq2, kk2, kv2 = jax.random.split(jax.random.PRNGKey(1), 3)
    q2 = jax.random.normal(kq2, (B2, H2, N2, D2), dtype=jnp.bfloat16)
    k2 = jax.random.normal(kk2, (B2, H2, Nk2, D2), dtype=jnp.bfloat16)
    v2 = jax.random.normal(kv2, (B2, H2, Nk2, D2), dtype=jnp.bfloat16)

    out2 = jax.block_until_ready(flash_attention(q2, k2, v2))
    ref2 = _reference(q2, k2, v2)
    err = float(jnp.max(jnp.abs(out2.astype(jnp.float32) - ref2)))
    assert err < 1e-1, f"bf16 multi-tile mismatch (max abs err {err})"

    print("KERNEL_OK")
</pallas_src>

<mosaic_0001>
module attributes {stable_mosaic.version = 11 : i64} {
  func.func @_flash_attn_kernel(%arg0: i32, %arg1: i32, %arg2: i32, %arg3: memref<1x8x32xf32, #tpu.memory_space<vmem>>, %arg4: memref<1x8x32xf32, #tpu.memory_space<vmem>>, %arg5: memref<1x8x32xf32, #tpu.memory_space<vmem>>, %arg6: memref<1x8x32xf32, #tpu.memory_space<vmem>>, %arg7: memref<8x32xf32, #tpu.memory_space<vmem>>, %arg8: memref<8x128xf32, #tpu.memory_space<vmem>>, %arg9: memref<8x128xf32, #tpu.memory_space<vmem>>, %arg10: memref<8x32xf32, #tpu.memory_space<vmem>>) attributes {dimension_semantics = [#tpu.dimension_semantics<parallel>, #tpu.dimension_semantics<parallel>, #tpu.dimension_semantics<arbitrary>], iteration_bounds = array<i64: 8, 1, 1>, scalar_prefetch = 0 : i64, scratch_operands = 4 : i64, tpu.core_type = #tpu.core_type<tc>, window_params = [{transform_indices = @transform_0, window_bounds = array<i64: 1, 8, 32>}, {transform_indices = @transform_1, window_bounds = array<i64: 1, 8, 32>}, {transform_indices = @transform_2, window_bounds = array<i64: 1, 8, 32>}, {transform_indices = @transform_3, window_bounds = array<i64: 1, 8, 32>}]} {
    %c0_i32 = arith.constant 0 : i32
    %0 = arith.cmpi eq, %arg2, %c0_i32 : i32
    %1 = arith.extui %0 : i1 to i32
    %c0_i32_0 = arith.constant 0 : i32
    %2 = arith.cmpi ne, %1, %c0_i32_0 : i32
    scf.if %2 {
      %c0_25 = arith.constant 0 : index
      %c0_26 = arith.constant 0 : index
      %c0_27 = arith.constant 0 : index
      %39 = vector.load %arg3[%c0_25, %c0_26, %c0_27] : memref<1x8x32xf32, #tpu.memory_space<vmem>>, vector<1x8x32xf32>
      %40 = vector.shape_cast %39 : vector<1x8x32xf32> to vector<8x32xf32>
      %cst_28 = arith.constant 0.176776692 : f32
      %41 = vector.broadcast %cst_28 : f32 to vector<8x32xf32>
      %42 = arith.mulf %40, %41 : vector<8x32xf32>
      %c0_29 = arith.constant 0 : index
      %c0_30 = arith.constant 0 : index
      %43 = vector.load %arg7[%c0_29, %c0_30] : memref<8x32xf32, #tpu.memory_space<vmem>>, vector<8x32xf32>
      tpu.vector_store %arg7[%c0_29, %c0_30], %42 {strides = array<i32>} : memref<8x32xf32, #tpu.memory_space<vmem>>, vector<8x32xf32>,
      %cst_31 = arith.constant 0xFF800000 : f32
      %44 = vector.broadcast %cst_31 : f32 to vector<8x128xf32>
      %c0_32 = arith.constant 0 : index
      %c0_33 = arith.constant 0 : index
      %45 = vector.load %arg8[%c0_32, %c0_33] : memref<8x128xf32, #tpu.memory_space<vmem>>, vector<8x128xf32>
      tpu.vector_store %arg8[%c0_32, %c0_33], %44 {strides = array<i32>} : memref<8x128xf32, #tpu.memory_space<vmem>>, vector<8x128xf32>,
      %cst_34 = arith.constant 0.000000e+00 : f32
      %46 = vector.broadcast %cst_34 : f32 to vector<8x128xf32>
      %c0_35 = arith.constant 0 : index
      %c0_36 = arith.constant 0 : index
      %47 = vector.load %arg9[%c0_35, %c0_36] : memref<8x128xf32, #tpu.memory_space<vmem>>, vector<8x128xf32>
      tpu.vector_store %arg9[%c0_35, %c0_36], %46 {strides = array<i32>} : memref<8x128xf32, #tpu.memory_space<vmem>>, vector<8x128xf32>,
      %cst_37 = arith.constant 0.000000e+00 : f32
      %48 = vector.broadcast %cst_37 : f32 to vector<8x32xf32>
      %c0_38 = arith.constant 0 : index
      %c0_39 = arith.constant 0 : index
      %49 = vector.load %arg10[%c0_38, %c0_39] : memref<8x32xf32, #tpu.memory_space<vmem>>, vector<8x32xf32>
      tpu.vector_store %arg10[%c0_38, %c0_39], %48 {strides = array<i32>} : memref<8x32xf32, #tpu.memory_space<vmem>>, vector<8x32xf32>,
    } else {
    }
    %c0 = arith.constant 0 : index
    %c0_1 = arith.constant 0 : index
    %3 = vector.load %arg7[%c0, %c0_1] : memref<8x32xf32, #tpu.memory_space<vmem>>, vector<8x32xf32>
    %c0_2 = arith.constant 0 : index
    %c0_3 = arith.constant 0 : index
    %c0_4 = arith.constant 0 : index
    %4 = vector.load %arg4[%c0_2, %c0_3, %c0_4] : memref<1x8x32xf32, #tpu.memory_space<vmem>>, vector<1x8x32xf32>
    %5 = vector.shape_cast %4 : vector<1x8x32xf32> to vector<8x32xf32>
    %c0_5 = arith.constant 0 : index
    %c0_6 = arith.constant 0 : index
    %c0_7 = arith.constant 0 : index
    %6 = vector.load %arg5[%c0_5, %c0_6, %c0_7] : memref<1x8x32xf32, #tpu.memory_space<vmem>>, vector<1x8x32xf32>
    %7 = vector.shape_cast %6 : vector<1x8x32xf32> to vector<8x32xf32>
    %cst = arith.constant dense<0.000000e+00> : vector<8x8xf32>
    %8 = tpu.matmul %3, %5, %cst {dimension_numbers = #tpu.dot_dimension_numbers<[1], [1], [0], [0], [0, 0, 1, 0], [], []>} : vector<8x32xf32>, vector<8x32xf32>, vector<8x8xf32> -> vector<8x8xf32>
    %c0_8 = arith.constant 0 : index
    %c0_9 = arith.constant 0 : index
    %9 = vector.load %arg8[%c0_8, %c0_9] : memref<8x128xf32, #tpu.memory_space<vmem>>, vector<8x128xf32>
    %cst_10 = arith.constant dense<0xFF800000> : vector<8xf32>
    %10 = vector.multi_reduction <maximumf>, %8, %cst_10 [1] : vector<8x8xf32> to vector<8xf32>
    %11 = vector.shape_cast %10 : vector<8xf32> to vector<8x1xf32>
    %12 = vector.broadcast %11 : vector<8x1xf32> to vector<8x128xf32>
    %13 = arith.maximumf %9, %12 : vector<8x128xf32>
    %14 = vector.extract_strided_slice %9 {offsets = [0, 0], sizes = [8, 1], strides = [1, 1]} : vector<8x128xf32> to vector<8x1xf32>
    %15 = arith.maximumf %14, %11 : vector<8x1xf32>
    %16 = arith.subf %9, %13 : vector<8x128xf32>
    %17 = math.exp %16 : vector<8x128xf32>
    %18 = vector.broadcast %15 : vector<8x1xf32> to vector<8x8xf32>
    %19 = arith.subf %8, %18 : vector<8x8xf32>
    %20 = math.exp %19 : vector<8x8xf32>
    %c0_11 = arith.constant 0 : index
    %c0_12 = arith.constant 0 : index
    %21 = vector.load %arg9[%c0_11, %c0_12] : memref<8x128xf32, #tpu.memory_space<vmem>>, vector<8x128xf32>
    %22 = arith.mulf %17, %21 : vector<8x128xf32>
    %cst_13 = arith.constant dense<0.000000e+00> : vector<8xf32>
    %23 = vector.multi_reduction <add>, %20, %cst_13 [1] : vector<8x8xf32> to vector<8xf32>
    %24 = vector.shape_cast %23 : vector<8xf32> to vector<8x1xf32>
    %25 = vector.broadcast %24 : vector<8x1xf32> to vector<8x128xf32>
    %26 = arith.addf %22, %25 : vector<8x128xf32>
    %c0_14 = arith.constant 0 : index
    %c0_15 = arith.constant 0 : index
    %27 = vector.load %arg9[%c0_14, %c0_15] : memref<8x128xf32, #tpu.memory_space<vmem>>, vector<8x128xf32>
    tpu.vector_store %arg9[%c0_14, %c0_15], %26 {strides = array<i32>} : memref<8x128xf32, #tpu.memory_space<vmem>>, vector<8x128xf32>,
    %28 = vector.extract_strided_slice %17 {offsets = [0, 0], sizes = [8, 1], strides = [1, 1]} : vector<8x128xf32> to vector<8x1xf32>
    %c0_16 = arith.constant 0 : index
    %c0_17 = arith.constant 0 : index
    %29 = vector.load %arg10[%c0_16, %c0_17] : memref<8x32xf32, #tpu.memory_space<vmem>>, vector<8x32xf32>
    %30 = vector.broadcast %28 : vector<8x1xf32> to vector<8x32xf32>
    %31 = arith.mulf %30, %29 : vector<8x32xf32>
    %cst_18 = arith.constant dense<0.000000e+00> : vector<8x32xf32>
    %32 = tpu.matmul %20, %7, %cst_18 {dimension_numbers = #tpu.dot_dimension_numbers<[1], [0], [0], [1], [0, 0, 1, 1], [], []>} : vector<8x8xf32>, vector<8x32xf32>, vector<8x32xf32> -> vector<8x32xf32>
    %33 = arith.addf %31, %32 : vector<8x32xf32>
    %c0_19 = arith.constant 0 : index
    %c0_20 = arith.constant 0 : index
    %34 = vector.load %arg10[%c0_19, %c0_20] : memref<8x32xf32, #tpu.memory_space<vmem>>, vector<8x32xf32>
    tpu.vector_store %arg10[%c0_19, %c0_20], %33 {strides = array<i32>} : memref<8x32xf32, #tpu.memory_space<vmem>>, vector<8x32xf32>,
    %c0_21 = arith.constant 0 : index
    %c0_22 = arith.constant 0 : index
    %35 = vector.load %arg8[%c0_21, %c0_22] : memref<8x128xf32, #tpu.memory_space<vmem>>, vector<8x128xf32>
    tpu.vector_store %arg8[%c0_21, %c0_22], %13 {strides = array<i32>} : memref<8x128xf32, #tpu.memory_space<vmem>>, vector<8x128xf32>,
    %c0_i32_23 = arith.constant 0 : i32
    %36 = arith.cmpi eq, %arg2, %c0_i32_23 : i32
    %37 = arith.extui %36 : i1 to i32
    %c0_i32_24 = arith.constant 0 : i32
    %38 = arith.cmpi ne, %37, %c0_i32_24 : i32
    scf.if %38 {
      %c0_25 = arith.constant 0 : index
      %c0_26 = arith.constant 0 : index
      %39 = vector.load %arg9[%c0_25, %c0_26] : memref<8x128xf32, #tpu.memory_space<vmem>>, vector<8x128xf32>
      %cst_27 = arith.constant 1.000000e+00 : f32
      %40 = vector.broadcast %cst_27 : f32 to vector<8x128xf32>
      %41 = arith.divf %40, %39 : vector<8x128xf32>
      %42 = vector.extract_strided_slice %41 {offsets = [0, 0], sizes = [8, 1], strides = [1, 1]} : vector<8x128xf32> to vector<8x1xf32>
      %c0_28 = arith.constant 0 : index
      %c0_29 = arith.constant 0 : index
      %43 = vector.load %arg10[%c0_28, %c0_29] : memref<8x32xf32, #tpu.memory_space<vmem>>, vector<8x32xf32>
      %44 = vector.broadcast %42 : vector<8x1xf32> to vector<8x32xf32>
      %45 = arith.mulf %43, %44 : vector<8x32xf32>
      %c0_30 = arith.constant 0 : index
      %c0_31 = arith.constant 0 : index
      %c0_32 = arith.constant 0 : index
      %46 = vector.load %arg6[%c0_30, %c0_31, %c0_32] : memref<1x8x32xf32, #tpu.memory_space<vmem>>, vector<1x8x32xf32>
      %47 = vector.shape_cast %46 : vector<1x8x32xf32> to vector<8x32xf32>
      %48 = vector.shape_cast %45 : vector<8x32xf32> to vector<1x8x32xf32>
      tpu.vector_store %arg6[%c0_30, %c0_31, %c0_32], %48 {strides = array<i32>} : memref<1x8x32xf32, #tpu.memory_space<vmem>>, vector<1x8x32xf32>,
    } else {
    }
    return
  }
  func.func @transform_0(%arg0: i32, %arg1: i32, %arg2: i32) -> (i32, i32, i32) {
    %c0_i32 = arith.constant 0 : i32
    %c0_i32_0 = arith.constant 0 : i32
    return %arg0, %arg1, %c0_i32 : i32, i32, i32
  }
  func.func @transform_1(%arg0: i32, %arg1: i32, %arg2: i32) -> (i32, i32, i32) {
    %c0_i32 = arith.constant 0 : i32
    %c0_i32_0 = arith.constant 0 : i32
    return %arg0, %arg2, %c0_i32 : i32, i32, i32
  }
  func.func @transform_2(%arg0: i32, %arg1: i32, %arg2: i32) -> (i32, i32, i32) {
    %c0_i32 = arith.constant 0 : i32
    %c0_i32_0 = arith.constant 0 : i32
    return %arg0, %arg2, %c0_i32 : i32, i32, i32
  }
  func.func @transform_3(%arg0: i32, %arg1: i32, %arg2: i32) -> (i32, i32, i32) {
    %c0_i32 = arith.constant 0 : i32
    %c0_i32_0 = arith.constant 0 : i32
    return %arg0, %arg1, %c0_i32 : i32, i32, i32
  }
}

</mosaic_0001>

<bundles_post_ra>
// kernel: tpu_custom_call.1
= control target key start
LH: loop header
LB: loop body
LE: loop exit
PB: predicated region body
PF: predicated region fallthrough
CT: control target
= control target key end

     0   :  { %s1163_s0 = inlined_call_operand.hbm [shape: f32[8,8,32], index: 0, kind: input, shape index: {}]   ;;  %s1164_s1 = inlined_call_operand.hbm [shape: f32[8,8,32], index: 1, kind: input, shape index: {}]   ;;  %s1165_s2 = inlined_call_operand.hbm [shape: f32[8,8,32], index: 2, kind: input, shape index: {}]   ;;  %s1166_s3 = inlined_call_operand.hbm [shape: f32[8,8,32], index: 3, kind: output, shape index: {}]  }
   0x1   :  { %1170 = sst [smem:[#allocation18_spill]] %s1164_s1 }
   0x2   :  { %8 = vsyncpa [#allocation7], 0 }
   0x3   :  { %10 = vsyncpa [#allocation7 + $0x1], 0 }
   0x4   :  { %11 = vsyncpa [#allocation10], 0 }
   0x5   :  { %13 = vsyncpa [#allocation10 + $0x1], 0 }
   0x6   :  { %14 = vsyncpa [#allocation8], 0 }
   0x7   :  { %16 = vsyncpa [#allocation8 + $0x1], 0  ;;  %s958_s12 = smov 0   ;;  %s960_s13 = smov 0  }
   0x8   :  { %s962_s14 = smov 0   ;;  %s964_s15 = smov 0  }
   0x9   :  { %s966_s16 = smov 0   ;;  %s968_s17 = smov 0  }
   0xa LB: > { %1171 = sst [smem:[#allocation16_spill]] %s925_s16  ;;  %s989_s18 = sadd.s32 4294967295, %s929_s17   ;;  %s929_s17 = sphi %s968_s17, %s22_s17   ;;  %s925_s16 = sphi %s966_s16, %s1182_s16   ;;  %s921_s15 = sphi %s964_s15, %s1181_s15   ;;  %s917_s14 = sphi %s962_s14, %s1185_s14   ;;  %s913_s13 = sphi %s960_s13, %s1184_s13   ;;  %s909_s12 = sphi %s958_s12, %s1183_s12  }
   0xb   : > { %s643_s19 = sadd.s32 4294967294, %s929_s17   ;;  %s41_s20 = sadd.s32 1, %s925_s16 }
   0xc   : > { %s50_s21 = sadd.s32 1, %s917_s14  ;;  %p43_p0 = scmp.ge.s32.totalorder %s41_s20, 8 }
   0xd   : > { %p57_p1 = scmp.ne.s32.totalorder %s917_s14, %s913_s13  ;;  %p58_p2 = scmp.eq.s32.totalorder %s929_s17, 0 }
   0xe   : > { %p63_p3 = scmp.ne.s32.totalorder %s913_s13, %s909_s12  ;;  %s1187_s20 = smov (%p43_p0, %s41_s20), 0 }
   0xf   : > { %1172 = sst [smem:[#allocation17_spill]] %s1187_s20  ;;  %p1001_p4 = por %p58_p2, %p57_p1 }
  0x10   : > { %p64_p5 = scmp.eq.s32.totalorder %s989_s18, 0  ;;  %s45_s23 = ssub.s32 %s925_s16, %s1187_s20 }
  0x11   : > { %p145_p6 = scmp.eq.s32.totalorder %s989_s18, 7  ;;  %p48_p7 = scmp.eq.s32.totalorder %s45_s23, 0 }
  0x12   : > { %p1009_p8 = por %p64_p5, %p63_p3  ;;  %p151_p10 = scmp.eq.s32.totalorder %s643_s19, 7 }
  0x13   : > { %p1013_p9 = por %p145_p6, %p57_p1  ;;  %p700_p12 = scmp.lt.s32.totalorder %s929_s17, 8 }
  0x14   : > { %s1018_s26 = scalar_select %p48_p7, %s917_s14, %s50_s21  }
  0x15   : > { %p1020_p11 = por %p151_p10, %p63_p3  ;;  %s1167_s28 = sand.u32 1, %s917_s14  }
  0x16   : > { %s1028_s29 = sshll.u32 %s1167_s28, 3  ;;  %s1031_s30 = sshll.u32 %s925_s16, 7 }
  0x17   : > { %p1035_p13 = pnand %p700_p12, %p1001_p4  ;;  %s190_s5 = sand.u32 1, %s929_s17  }
  0x18   : > { %s1178_s1 = sld [smem:[#allocation18_spill]]  ;;  %s194_s9 = scalar_lea.vmem [#allocation9], %s1028_s29 }
  0x19   : > { %s202_s10 = sshll.u32 %s194_s9, 4  ;;  %p652_p0 = scmp.ge.s32.totalorder %s929_s17, 1  ;;  %s203_s10 = int_to_ptr.vmem [resolvable:$true] %s202_s10 }
  0x1a   : > { %p226_p1 = scmp.lt.s32.totalorder %s929_s17, 9  ;;  %s1047_s11 = scalar_lea.sflag [#allocation10], %s190_s5 }
  0x1b   : > { %p763_p2 = pneg %p1035_p13  ;;  %s774_s19 = scalar_lea.vmem %s203_s10, 128 }
  0x1c   : > { %p775_p3 = scmp.ne.s32.totalorder %s203_s10, %s774_s19  ;;  %s931_s21 = smov [#allocation9]  }
  0x1d   : > { %s779_s22 = sshll.u32 %s931_s21, 4  ;;  %s780_s22 = int_to_ptr.vmem [resolvable:$false] %s779_s22 }
  0x1e   : > { %s200_s8 = scalar_lea.hbm %s1178_s1, %s1031_s30  ;;  %p777_p4 = pnand %p775_p3, %p763_p2 }
  0x1f   : > { %s781_s23 = scalar_lea.vmem %s780_s22, 256  ;;  %p782_p6 = scmp.lt.s32.totalorder %s203_s10, %s780_s22 }
  0x20   : > { %p778_p5 = pneg %p777_p4  ;;  %p783_p7 = scmp.lt.s32.totalorder %s781_s23, %s774_s19 }
  0x22   : > { %p784_p10 = por %p783_p7, %p782_p6 }
  0x24   : > { %p785_p12 = pnand %p784_p10, %p778_p5 }
  0x26   : > { %788 = shalt.err (!%p785_p12)
}
  0x27   : > { %692 = dma.hbm_to_vmem [thread:$0]  (!%p1035_p13), %s200_s8, 128, %s203_s10, %s1047_s11  }
  0x28   : > { %p1061_p3 = pnand %p652_p0, %p226_p1  ;;  %s181_s9 = scalar_lea.hbm %s1163_s0, %s1031_s30 }
  0x29   : > { %s175_s19 = scalar_lea.vmem [#allocation6], %s1028_s29  ;;  %s219_s28 = scalar_lea.hbm %s1165_s2, %s1031_s30 }
  0x2a   : > { %s183_s21 = sshll.u32 %s175_s19, 4  ;;  %s1180_s1 = sand.u32 1, %s917_s14   ;;  %s184_s21 = int_to_ptr.vmem [resolvable:$true] %s183_s21 }
  0x2b   : > { %s172_s20 = scalar_lea.sflag [#allocation7], %s1180_s1  ;;  %s802_s8 = scalar_lea.vmem %s184_s21, 128 }
  0x2c   : > { %p803_p4 = scmp.ne.s32.totalorder %s184_s21, %s802_s8  ;;  %s932_s10 = smov [#allocation6]  }
  0x2d   : > { %s807_s16 = sshll.u32 %s932_s10, 4  ;;  %s808_s16 = int_to_ptr.vmem [resolvable:$false] %s807_s16 }
  0x2e   : > { %p805_p0 = pnand %p803_p4, %p763_p2  ;;  %s809_s6 = scalar_lea.vmem %s808_s16, 256 }
  0x2f   : > { %p810_p5 = scmp.lt.s32.totalorder %s184_s21, %s808_s16  ;;  %p811_p6 = scmp.lt.s32.totalorder %s809_s6, %s802_s8 }
  0x30   : > { %p806_p1 = pneg %p805_p0 }
  0x31   : > { %p812_p7 = por %p811_p6, %p810_p5 }
  0x33   : > { %p813_p10 = pnand %p812_p7, %p806_p1 }
  0x35   : > { %816 = shalt.err (!%p813_p10)
}
  0x36   : > { %689 = dma.hbm_to_vmem [thread:$0]  (!%p1035_p13), %s181_s9, 128, %s184_s21, %s172_s20  }
  0x37   : > { %s213_s1 = scalar_lea.vmem [#allocation11], %s1028_s29  ;;  %s933_s22 = smov [#allocation11]  }
  0x38   : > { %s221_s7 = sshll.u32 %s213_s1, 4  ;;  %s835_s16 = sshll.u32 %s933_s22, 4  ;;  %s222_s7 = int_to_ptr.vmem [resolvable:$true] %s221_s7  ;;  %s836_s16 = int_to_ptr.vmem [resolvable:$false] %s835_s16 }
  0x39   : > { %s830_s19 = scalar_lea.vmem %s222_s7, 128  ;;  %s837_s23 = scalar_lea.vmem %s836_s16, 256 }
  0x3a   : > { %p831_p12 = scmp.ne.s32.totalorder %s222_s7, %s830_s19  ;;  %p838_p1 = scmp.lt.s32.totalorder %s222_s7, %s836_s16 }
  0x3b   : > { %p839_p5 = scmp.lt.s32.totalorder %s837_s23, %s830_s19 }
  0x3c   : > { %p833_p4 = pnand %p831_p12, %p763_p2 }
  0x3d   : > { %p840_p6 = por %p839_p5, %p838_p1 }
  0x3e   : > { %p834_p0 = pneg %p833_p4 }
  0x40   : > { %p841_p7 = pnand %p840_p6, %p834_p0 }
  0x42   : > { %844 = shalt.err (!%p841_p7)
}
  0x43   : > { %695 = dma.hbm_to_vmem [thread:$0]  (!%p1035_p13), %s219_s28, 128, %s222_s7, %s1047_s11  }
  0x44   : > { %230 = sbr.rel (%p1061_p3) target bundleno = 856 (0x358), region = 32  ;;  %s1096_s9 = sand.u32 (!%p1061_p3), 1, %s913_s13  }
  0x45   : > { %s1099_s21 = sshll.u32 (!%p1061_p3), %s1096_s9, 3  ;;  %s233_s4 = scalar_lea.sflag (!%p1061_p3), [#allocation7], %s1096_s9 }
  0x46   : > { %s236_s8 = scalar_lea.vmem (!%p1061_p3), [#allocation6], %s1099_s21 }
  0x49   : > { %896 = dma.done.wait (%p1009_p8), %s233_s4, 128  }
  0x4a   : > { %898 = vsyncadd (%p1009_p8), %s233_s4, 4294967168  ;;  %s241_s28 = sand.u32 1, %s989_s18   ;;  %s245_s11 = scalar_lea.vmem [#allocation9], %s1099_s21 }
  0x4b   : > { %s242_s30 = scalar_lea.sflag [#allocation10], %s241_s28 }
  0x4c   : > { %900 = dma.done.wait (%p1009_p8), %s242_s30, 256  }
  0x4d   : > { %902 = vsyncadd (%p1009_p8), %s242_s30, 4294967040  ;;  %vm293_vm0 = vcmask 261120   ;;  %v934_v0 = vmov 0.0   ;;  %vm935_vm1 = vmmov 0   ;;  %v291_v1 = vld [vmem:[%s236_s8] sm:$0xff]  ;;  %v299_v2 = vld [vmem:[%s245_s11] sm:$0xff] }
  0x4e   : > { %668 = vmatprep.subr.mxu0 %v934_v0  ;;  %297 = vst.msk [vmem:[#allocation5] sm:$0xff] %vm293_vm0, %v934_v0  ;;  %670 = vmatprep.mubr.msk.f32.mxu0 %vm935_vm1, %v934_v0  ;;  %v292_v3 = vmul.f32 0.17677669, %v291_v1  ;;  %v936_v5 = vmov 0   ;;  %vm379_vm2 = vcmask 64512   ;;  %s254_s18 = scalar_lea.vmem [#allocation11], %s1099_s21 }
  0x4f   : > { %673 = vmatprep.subr.mxu1 %v934_v0  ;;  %675 = vmatprep.mubr.msk.f32.mxu1 %vm935_vm1, %v934_v0  ;;  %v300_v10 = vld [vmem:[%s254_s18] sm:$0xff]  ;;  %s661_s24 = sshll.u32 %s921_s15, 7  ;;  %s286_s5 = scalar_lea.vmem [#allocation12], %s1099_s21 }
  0x50   : > { %669 = vmatpush3.xpose.msk.msra.mxu0 %vm293_vm0, %v299_v2  ;;  %294 = vst.msk [vmem:[#allocation2] sm:$0xff] %vm293_vm0, %v292_v3  ;;  %753 = vset.pattern.permute.xlu0 %v936_v5  ;;  %s514_s10 = sshll.u32 %s286_s5, 4  ;;  %s512_s7 = scalar_lea.hbm %s1166_s3, %s661_s24  ;;  %s515_s10 = int_to_ptr.vmem [resolvable:$true] %s514_s10 }
  0x51   : > { %754 = vset.pattern.permute.xlu1 %v936_v5  ;;  %674 = vmatpush3.msra.mxu1 %v300_v10  ;;  %s500_s19 = scalar_lea.sflag [#allocation8], %s1096_s9  ;;  %s845_s22 = scalar_lea.vmem %s515_s10, 128 }
  0x52   : > { %p846_p8 = scmp.ne.s32.totalorder %s515_s10, %s845_s22  ;;  %s937_s16 = smov [#allocation12]  }
  0x53   : > { %s849_s15 = sshll.u32 %s937_s16, 4  ;;  %s850_s15 = int_to_ptr.vmem [resolvable:$false] %s849_s15 }
  0x54   : > { %p847_p13 = pnand %p846_p8, %p1013_p9  ;;  %s851_s23 = scalar_lea.vmem %s850_s15, 256 }
  0x55   : > { %v402_v23 = vld [vmem:[#allocation5] sm:$0xff]  ;;  %p852_p3 = scmp.lt.s32.totalorder %s515_s10, %s850_s15  ;;  %p853_p10 = scmp.lt.s32.totalorder %s851_s23, %s845_s22 }
  0x56   : > { %p848_p2 = pneg %p847_p13 }
  0x57   : > { %v298_v4 = vld [vmem:[#allocation2] sm:$0xff]  ;;  %p854_p12 = por %p853_p10, %p852_p3 }
  0x58   : > { %671 = vmatmul.mubr.msk.f32.vlgmr.msra.gmra.mxu0 %vm293_vm0, %v298_v4 }
  0x59   : > { %p855_p4 = pnand %p854_p12, %p848_p2 }
 0x118   : > { %v374_v6 = vpop.f32.mrf.mxu0 }
 0x119   : > { %v380_v7 = vsel %vm379_vm2, %v374_v6, -inf }
 0x11a   : > { %381 = vmax.xlane.f32.xlu0 %v380_v7  ;;  %v672_v8 = vpop.f32.mrf.mxu0 }
 0x1a3   : > { %v382_v9 = vpop.xlane.xlu0 %381 }
 0x1a4   : > { %389 = vperm.xlu0 %753, %v382_v9   ;;  %v384_v14 = vsub.f32 -inf, %v382_v9 }
 0x1a6   : > { %v385_v16 = vmul.f32 1.442695, %v384_v14 }
 0x21f   : > { %v390_v11 = vpop.permute.xlu0 %389 }
 0x220   : > { %v392_v12 = vsub.f32 %v374_v6, %v390_v11 }
 0x222   : > { %v393_v13 = vmul.f32 1.442695, %v392_v12 }
 0x224   : > { %755 = vpow2.f32 %v393_v13 }
 0x225   : > { %757 = vpow2.f32 %v385_v16 }
 0x231   : > { %v756_v15 = vpop.eup %755 }
 0x232   : > { %676 = vmatmul.mubr.msk.f32.vlgmr.msra.gmra.mxu1 %vm379_vm2, %v756_v15  ;;  %v397_v17 = vsel %vm379_vm2, %v756_v15, 0.0  ;;  %v758_v18 = vpop.eup %757 }
 0x233   : > { %398 = vadd.xlane.f32.xlu1 %v397_v17  ;;  %v396_v19 = vmul.f32 0.0, %v758_v18 }
 0x244   : > { %405 = vperm.xlu1 %754, %v758_v18  }
 0x2bc   : > { %v399_v20 = vpop.xlane.xlu1 %398 }
 0x2bd   : > { %v400_v21 = vadd.f32 %v399_v20, %v396_v19 }
 0x2bf   : > { %759 = vrcp.f32 %v400_v21 }
 0x2c0   : > { %v406_v24 = vpop.permute.xlu1 %405 }
 0x2c1   : > { %v408_v25 = vmul.f32 %v406_v24, %v402_v23 }
 0x2cc   : > { %v760_v22 = vpop.eup %759 }
 0x2cd   : > { %494 = vperm.xlu1 %754, %v760_v22  }
 0x2f2   : > { %v478_v26 = vpop.f32.mrf.mxu1 }
 0x2f3   : > { %v482_v27 = vadd.f32 %v478_v26, %v408_v25 }
 0x2f4   : > { %v677_v28 = vpop.f32.mrf.mxu1 }
 0x2f5   : > { %483 = vst.msk [vmem:[#allocation5] sm:$0xff] %vm293_vm0, %v482_v27 }
 0x2fc   : > { %v491_v29 = vld [vmem:[#allocation5] sm:$0xff] }
 0x348   : > { %v495_v30 = vpop.permute.xlu1 %494 }
 0x349   : > { %v497_v31 = vmul.f32 %v495_v30, %v491_v29 }
 0x34b   : > { %498 = vst.msk [vmem:[%s286_s5] sm:$0xff] %vm293_vm0, %v497_v31 }
 0x34c   : > { %858 = shalt.err (!%p855_p4)
}
 0x34d   : > { %s859_s20 = scalar_lea.hbm %s512_s7, 128  ;;  %s863_s21 = scalar_lea.hbm %s1166_s3, 1024 }
 0x34e   : > { %p860_p0 = scmp.ne.s32.totalorder %s512_s7, %s859_s20  ;;  %p864_p6 = scmp.lt.s32.totalorder %s512_s7, %s1166_s3 }
 0x34f   : > { %p865_p7 = scmp.lt.s32.totalorder %s863_s21, %s859_s20 }
 0x350   : > { %p861_p1 = pnand %p860_p0, %p1013_p9 }
 0x351   : > { %p866_p8 = por %p865_p7, %p864_p6 }
 0x352   : > { %p862_p5 = pneg %p861_p1 }
 0x354   : > { %p867_p13 = pnand %p866_p8, %p862_p5 }
 0x356   : > { %870 = shalt.err (!%p867_p13)
}
 0x357   : > { %684 = dma.vmem_to_hbm [thread:$0]  (%p1013_p9), %s515_s10, 128, %s512_s7, %s500_s19  }
 0x358 PF: > { %p701_p2 = scmp.ge.s32.totalorder %s929_s17, 2  ;;  %s526_s28 = sand.u32 1, %s909_s12  }
 0x359   : > { %s527_s30 = scalar_lea.sflag [#allocation8], %s526_s28 }
 0x35a   : > { %p697_p3 = pnand %p701_p2, %p1020_p11 }
 0x35c   : > { %p698_p10 = pneg %p697_p3 }
 0x35e   : > { %904 = dma.done.wait (%p698_p10), %s527_s30, 128  }
 0x35f   : > { %906 = vsyncadd (%p698_p10), %s527_s30, 4294967168  ;;  %s22_s17 = sadd.s32 1, %s929_s17   ;;  %s1181_s15 = sld [smem:[#allocation16_spill]] }
 0x360   : > { %p19_p12 = scmp.ge.s32.totalorder %s22_s17, 10   ;;  %s1182_s16 = sld [smem:[#allocation17_spill]] }
 0x361   : > { %s1183_s12 = smov %s913_s13  ;;  %s1184_s13 = smov %s917_s14 }
 0x362   : > { %s1185_s14 = smov %s1018_s26  ;;  %21 = sbr.rel (!%p19_p12) target bundleno = 10 (0xa), region = 109 }
 0x367   :  { %532 = vsyncpa [#allocation7], 1 }
 0x368   :  { %534 = vsyncpa [#allocation7 + $0x1], 1 }
 0x369   :  { %535 = vsyncpa [#allocation10], 1 }
 0x36a   :  { %537 = vsyncpa [#allocation10 + $0x1], 1 }
 0x36b   :  { %538 = vsyncpa [#allocation8], 1 }
 0x36c   :  { %540 = vsyncpa [#allocation8 + $0x1], 1 }

</bundles_post_ra>
